<compile_context>
chip_gen: v5e
topology: v5e:2x2
jax: 0.10.0
libtpu: 0.0.40
codegen_flags: <defaults>
</compile_context>

<pallas_src>
import jax
import jax.numpy as jnp
from jax.experimental import pallas as pl
from jax.experimental.pallas import tpu as pltpu

# ImageNet normalization constants from the module's __init__.
_MEAN = (0.485, 0.456, 0.406)
_STD = (0.229, 0.224, 0.225)

_MIB = 1024 * 1024
_MAX_LANE_WIDTH = 4096  # cap on the reshaped lane (last-dim) width


def _make_kernel(num_channels, mean, inv_std):
    """Elementwise normalize kernel over a (TB, C, TR, L) VMEM tile."""

    def kernel(x_ref, o_ref):
        # Static (unrolled) loop over the small channel axis; mean/inv_std are
        # Python floats -> pure scalar VPU constants, 2 VPU ops per element.
        for c in range(num_channels):
            xc = x_ref[:, c, :, :]
            o_ref[:, c, :, :] = ((xc - mean[c]) * inv_std[c]).astype(o_ref.dtype)

    return kernel


def _tpu_budgets():
    """(target input bytes per block, vmem_limit_bytes) — generation aware."""
    cap = 64 * _MIB  # conservative default (v7x per-core physical VMEM)
    try:
        info = pltpu.get_tpu_info()
        got = getattr(info, "vmem_capacity_bytes", None)
        if got:
            cap = int(got)
    except Exception:
        pass
    if cap >= 96 * _MIB:
        # v5e / v6e: 128 MiB physical VMEM -> generous scoped limit.
        return 8 * _MIB, 64 * _MIB
    # v7x: 64 MiB physical. 8 MiB blocks => in+out double-buffered = 32 MiB.
    return 8 * _MIB, 48 * _MIB


def _pick_lane_width(spatial):
    """Pick a lane width L (multiple of 128) dividing `spatial`.

    Preference order:
      1. largest L <= _MAX_LANE_WIDTH whose quotient R = spatial // L is a
         multiple of 8 (sublane-aligned, no (8,128) tile padding),
      2. largest dividing L <= _MAX_LANE_WIDTH,
      3. any dividing multiple of 128 (including spatial itself),
      4. None (no lane-dense reshape possible).
    """
    best_aligned = None
    best_capped = None
    best_any = None
    for cand in range(128, spatial + 1, 128):
        if spatial % cand:
            continue
        best_any = cand  # ascending -> ends at the largest divisor
        if cand <= _MAX_LANE_WIDTH:
            best_capped = cand
            if (spatial // cand) % 8 == 0:
                best_aligned = cand
    return best_aligned or best_capped or best_any


def _pick_tiles(batch, channels, rows, lane, itemsize, target_bytes):
    """Choose (TB, TR, sublane_quantum) so a block is ~target_bytes of input."""
    sub_q = max(8, 32 // itemsize)            # sublane quantum for this dtype
    row_bytes = channels * lane * itemsize    # one R-row across all channels
    plane_bytes = rows * row_bytes            # one full batch element
    if plane_bytes <= target_bytes:
        # Whole plane fits: keep each block a contiguous leading-dim (batch)
        # slice of the NCHW array -> one linear HBM run per DMA.
        tr = rows
        tb = int(min(batch, max(1, target_bytes // plane_bytes)))
    else:
        # Very large image: split rows, sublane-aligned.
        tb = 1
        tr = int(max(1, target_bytes // row_bytes))
        if tr >= rows:
            tr = rows
        else:
            tr = max(sub_q, (tr // sub_q) * sub_q)
            tr = min(tr, rows)
    return tb, tr, sub_q


def _shape_grid(batch, rows, tb, tr, sub_q, min_steps):
    """Ensure a multi-step (preferably even) grid for 2-core TPUs + pipelining."""
    cdiv = lambda a, b: -(-a // b)
    steps = lambda b_, r_: cdiv(batch, b_) * cdiv(rows, r_)

    # Split the batch axis first (keeps DMAs contiguous leading-dim runs).
    while steps(tb, tr) < min_steps and tb > 1:
        tb = cdiv(tb, 2)
    # Then split rows (sublane-aligned) if the batch axis is exhausted.
    while steps(tb, tr) < min_steps and tr > sub_q:
        new_tr = max(sub_q, cdiv(cdiv(tr, 2), sub_q) * sub_q)
        if new_tr >= tr:
            break
        tr = new_tr
    # Prefer an even total step count (balanced split across v7x's 2 cores),
    # as long as it does not shrink the batch tile below half.
    if steps(tb, tr) % 2 and tb > 1:
        for cand in range(tb - 1, max(tb // 2, 1) - 1, -1):
            if steps(cand, tr) % 2 == 0:
                tb = cand
                break
    return tb, tr


def preprocess(x: jax.Array) -> jax.Array:
    """Pallas TPU implementation of PreProcessing.forward (channel normalize)."""
    B, C, H, W = x.shape
    assert C == len(_MEAN), "PreProcessing is defined for 3-channel RGB input"
    itemsize = x.dtype.itemsize
    target_block_bytes, vmem_limit = _tpu_budgets()

    # Lane-dense view of the spatial plane (free reshape for contiguous NCHW).
    S = H * W
    L = _pick_lane_width(S)
    if L is not None:
        R = S // L
        xv = x.reshape(B, C, R, L)
    else:
        # Fallback (H*W has no multiple-of-128 divisor): keep (H, W); the last
        # dim equals the full extent so the (8, 128) block rule still holds.
        R, L = H, W
        xv = x

    TB, TR, sub_q = _pick_tiles(B, C, R, L, itemsize, target_block_bytes)

    total_elems = B * C * H * W
    total_bytes = total_elems * itemsize
    min_steps = 4 if total_bytes >= 4 * _MIB else 2
    TB, TR = _shape_grid(B, R, TB, TR, sub_q, min_steps)

    block = (TB, C, TR, L)
    grid = (pl.cdiv(B, TB), pl.cdiv(R, TR))

    kernel = _make_kernel(C, _MEAN, tuple(1.0 / s for s in _STD))

    out = pl.pallas_call(
        kernel,
        out_shape=jax.ShapeDtypeStruct((B, C, R, L), x.dtype),
        grid=grid,
        in_specs=[pl.BlockSpec(block, lambda bi, ri: (bi, 0, ri, 0))],
        out_specs=pl.BlockSpec(block, lambda bi, ri: (bi, 0, ri, 0)),
        compiler_params=pltpu.CompilerParams(
            dimension_semantics=("parallel", "parallel"),
            # in+out double buffers = 4x block (<= 32 MiB at the 8 MiB target);
            # the generation-aware limit leaves headroom on every chip.
            vmem_limit_bytes=vmem_limit,
        ),
        cost_estimate=pl.CostEstimate(
            flops=2 * total_elems,
            transcendentals=0,
            bytes_accessed=2 * total_bytes,
        ),
    )(xv)

    return out.reshape(B, C, H, W)


def _reference(x: jax.Array) -> jax.Array:
    mean = jnp.asarray(_MEAN, dtype=x.dtype)[None, :, None, None]
    std = jnp.asarray(_STD, dtype=x.dtype)[None, :, None, None]
    return (x - mean) / std


if __name__ == "__main__":
    key = jax.random.PRNGKey(0)
    # Small image-like input consistent with the module: NCHW, 3 channels.
    x = jax.random.uniform(key, (2, 3, 16, 16), dtype=jnp.float32)

    out = preprocess(x)
    out = jax.block_until_ready(out)

    ref = _reference(x)
    assert out.shape == ref.shape and out.dtype == ref.dtype
    assert jnp.allclose(out, ref, atol=1e-5, rtol=1e-5), "mismatch vs reference"

    print("KERNEL_OK")
</pallas_src>

<mosaic_0001>
module attributes {stable_mosaic.version = 11 : i64} {
  func.func @kernel(%arg0: i32, %arg1: i32, %arg2: memref<1x3x1x256xf32, #tpu.memory_space<vmem>>, %arg3: memref<1x3x1x256xf32, #tpu.memory_space<vmem>>) attributes {dimension_semantics = [#tpu.dimension_semantics<parallel>, #tpu.dimension_semantics<parallel>], iteration_bounds = array<i64: 2, 1>, scalar_prefetch = 0 : i64, scratch_operands = 0 : i64, tpu.core_type = #tpu.core_type<tc>, window_params = [{transform_indices = @transform_0, window_bounds = array<i64: 1, 3, 1, 256>}, {transform_indices = @transform_1, window_bounds = array<i64: 1, 3, 1, 256>}]} {
    %c0 = arith.constant 0 : index
    %c0_0 = arith.constant 0 : index
    %c0_1 = arith.constant 0 : index
    %c0_2 = arith.constant 0 : index
    %0 = vector.load %arg2[%c0, %c0_0, %c0_1, %c0_2] : memref<1x3x1x256xf32, #tpu.memory_space<vmem>>, vector<1x1x1x256xf32>
    %1 = vector.shape_cast %0 : vector<1x1x1x256xf32> to vector<1x1x256xf32>
    %cst = arith.constant 4.850000e-01 : f32
    %2 = vector.broadcast %cst : f32 to vector<1x1x256xf32>
    %3 = arith.subf %1, %2 : vector<1x1x256xf32>
    %cst_3 = arith.constant 4.36681223 : f32
    %4 = vector.broadcast %cst_3 : f32 to vector<1x1x256xf32>
    %5 = arith.mulf %3, %4 : vector<1x1x256xf32>
    %c0_4 = arith.constant 0 : index
    %c0_5 = arith.constant 0 : index
    %c0_6 = arith.constant 0 : index
    %c0_7 = arith.constant 0 : index
    %6 = vector.load %arg3[%c0_4, %c0_5, %c0_6, %c0_7] : memref<1x3x1x256xf32, #tpu.memory_space<vmem>>, vector<1x1x1x256xf32>
    %7 = vector.shape_cast %6 : vector<1x1x1x256xf32> to vector<1x1x256xf32>
    %8 = vector.shape_cast %5 : vector<1x1x256xf32> to vector<1x1x1x256xf32>
    tpu.vector_store %arg3[%c0_4, %c0_5, %c0_6, %c0_7], %8 {strides = array<i32>} : memref<1x3x1x256xf32, #tpu.memory_space<vmem>>, vector<1x1x1x256xf32>,
    %c0_8 = arith.constant 0 : index
    %c1 = arith.constant 1 : index
    %c0_9 = arith.constant 0 : index
    %c0_10 = arith.constant 0 : index
    %9 = vector.load %arg2[%c0_8, %c1, %c0_9, %c0_10] : memref<1x3x1x256xf32, #tpu.memory_space<vmem>>, vector<1x1x1x256xf32>
    %10 = vector.shape_cast %9 : vector<1x1x1x256xf32> to vector<1x1x256xf32>
    %cst_11 = arith.constant 4.560000e-01 : f32
    %11 = vector.broadcast %cst_11 : f32 to vector<1x1x256xf32>
    %12 = arith.subf %10, %11 : vector<1x1x256xf32>
    %cst_12 = arith.constant 4.46428585 : f32
    %13 = vector.broadcast %cst_12 : f32 to vector<1x1x256xf32>
    %14 = arith.mulf %12, %13 : vector<1x1x256xf32>
    %c0_13 = arith.constant 0 : index
    %c1_14 = arith.constant 1 : index
    %c0_15 = arith.constant 0 : index
    %c0_16 = arith.constant 0 : index
    %15 = vector.load %arg3[%c0_13, %c1_14, %c0_15, %c0_16] : memref<1x3x1x256xf32, #tpu.memory_space<vmem>>, vector<1x1x1x256xf32>
    %16 = vector.shape_cast %15 : vector<1x1x1x256xf32> to vector<1x1x256xf32>
    %17 = vector.shape_cast %14 : vector<1x1x256xf32> to vector<1x1x1x256xf32>
    tpu.vector_store %arg3[%c0_13, %c1_14, %c0_15, %c0_16], %17 {strides = array<i32>} : memref<1x3x1x256xf32, #tpu.memory_space<vmem>>, vector<1x1x1x256xf32>,
    %c0_17 = arith.constant 0 : index
    %c2 = arith.constant 2 : index
    %c0_18 = arith.constant 0 : index
    %c0_19 = arith.constant 0 : index
    %18 = vector.load %arg2[%c0_17, %c2, %c0_18, %c0_19] : memref<1x3x1x256xf32, #tpu.memory_space<vmem>>, vector<1x1x1x256xf32>
    %19 = vector.shape_cast %18 : vector<1x1x1x256xf32> to vector<1x1x256xf32>
    %cst_20 = arith.constant 4.060000e-01 : f32
    %20 = vector.broadcast %cst_20 : f32 to vector<1x1x256xf32>
    %21 = arith.subf %19, %20 : vector<1x1x256xf32>
    %cst_21 = arith.constant 4.44444466 : f32
    %22 = vector.broadcast %cst_21 : f32 to vector<1x1x256xf32>
    %23 = arith.mulf %21, %22 : vector<1x1x256xf32>
    %c0_22 = arith.constant 0 : index
    %c2_23 = arith.constant 2 : index
    %c0_24 = arith.constant 0 : index
    %c0_25 = arith.constant 0 : index
    %24 = vector.load %arg3[%c0_22, %c2_23, %c0_24, %c0_25] : memref<1x3x1x256xf32, #tpu.memory_space<vmem>>, vector<1x1x1x256xf32>
    %25 = vector.shape_cast %24 : vector<1x1x1x256xf32> to vector<1x1x256xf32>
    %26 = vector.shape_cast %23 : vector<1x1x256xf32> to vector<1x1x1x256xf32>
    tpu.vector_store %arg3[%c0_22, %c2_23, %c0_24, %c0_25], %26 {strides = array<i32>} : memref<1x3x1x256xf32, #tpu.memory_space<vmem>>, vector<1x1x1x256xf32>,
    return
  }
  func.func @transform_0(%arg0: i32, %arg1: i32) -> (i32, i32, i32, i32) {
    %c0_i32 = arith.constant 0 : i32
    %c0_i32_0 = arith.constant 0 : i32
    %c0_i32_1 = arith.constant 0 : i32
    return %arg0, %c0_i32, %arg1, %c0_i32_0 : i32, i32, i32, i32
  }
  func.func @transform_1(%arg0: i32, %arg1: i32) -> (i32, i32, i32, i32) {
    %c0_i32 = arith.constant 0 : i32
    %c0_i32_0 = arith.constant 0 : i32
    %c0_i32_1 = arith.constant 0 : i32
    return %arg0, %c0_i32, %arg1, %c0_i32_0 : i32, i32, i32, i32
  }
}

</mosaic_0001>

<bundles_post_ra>
// kernel: tpu_custom_call.1
= control target key start
LH: loop header
LB: loop body
LE: loop exit
PB: predicated region body
PF: predicated region fallthrough
CT: control target
= control target key end

     0   :  { %6 = vsyncpa [#allocation3], 0  ;;  %s608_s0 = inlined_call_operand.hbm [shape: f32[2,3,1,256], index: 0, kind: input, shape index: {}]   ;;  %s609_s1 = inlined_call_operand.hbm [shape: f32[2,3,1,256], index: 1, kind: output, shape index: {}]  }
   0x1   :  { %8 = vsyncpa [#allocation3 + $0x1], 0 }
   0x2   :  { %9 = vsyncpa [#allocation4], 0 }
   0x3   :  { %11 = vsyncpa [#allocation4 + $0x1], 0  ;;  %s488_s6 = smov 0   ;;  %s490_s7 = smov 0  }
   0x4   :  { %s492_s8 = smov 0   ;;  %s494_s9 = smov 0  }
   0x5   :  { %s496_s10 = smov 0   ;;  %s498_s11 = smov 0  }
   0x6 LB: > { %s276_s12 = sadd.s32 4294967295, %s472_s11   ;;  %s277_s13 = sadd.s32 4294967294, %s472_s11   ;;  %s472_s11 = sphi %s498_s11, %s17_s11   ;;  %s468_s10 = sphi %s496_s10, %s618_s10   ;;  %s464_s9 = sphi %s494_s9, %s617_s9   ;;  %s460_s8 = sphi %s492_s8, %s616_s8   ;;  %s456_s7 = sphi %s490_s7, %s615_s7   ;;  %s452_s6 = sphi %s488_s6, %s614_s6  }
   0x7   : > { %s29_s14 = sadd.s32 1, %s468_s10  ;;  %s38_s15 = sadd.s32 1, %s460_s8 }
   0x8   : > { %p31_p0 = scmp.ge.s32.totalorder %s29_s14, 2  ;;  %p45_p1 = scmp.ne.s32.totalorder %s460_s8, %s456_s7 }
   0x9   : > { %p46_p2 = scmp.eq.s32.totalorder %s472_s11, 0  ;;  %p51_p3 = scmp.ne.s32.totalorder %s456_s7, %s452_s6 }
   0xa   : > { %s620_s14 = smov (%p31_p0, %s29_s14), 0  ;;  %p52_p5 = scmp.eq.s32.totalorder %s276_s12, 0 }
   0xb   : > { %p529_p4 = por %p46_p2, %p45_p1  ;;  %s33_s17 = ssub.s32 %s468_s10, %s620_s14 }
   0xc   : > { %p77_p6 = scmp.eq.s32.totalorder %s276_s12, 1  ;;  %p36_p7 = scmp.eq.s32.totalorder %s33_s17, 0 }
   0xd   : > { %p535_p8 = por %p52_p5, %p51_p3  ;;  %p83_p10 = scmp.eq.s32.totalorder %s277_s13, 1 }
   0xe   : > { %p539_p9 = por %p77_p6, %p45_p1  ;;  %p279_p12 = scmp.ge.s32.totalorder %s472_s11, 2 }
   0xf   : > { %s544_s20 = scalar_select %p36_p7, %s460_s8, %s38_s15  }
  0x10   : > { %p546_p11 = por %p83_p10, %p51_p3  ;;  %p306_p13 = scmp.lt.s32.totalorder %s472_s11, 2 }
  0x11   : > { %s103_s22 = sand.u32 1, %s460_s8   ;;  %s291_s24 = smul.u32 6, %s468_s10 }
  0x12   : > { %s290_s23 = smul.u32 6, %s103_s22  ;;  %p299_p0 = pnand %p306_p13, %p529_p4 }
  0x13   : > { %s113_s27 = scalar_lea.hbm %s608_s0, %s291_s24  ;;  %p280_p1 = scmp.ge.s32.totalorder %s472_s11, 1 }
  0x14   : > { %s107_s28 = scalar_lea.vmem [#allocation2], %s290_s23  ;;  %s114_s30 = sshll.u32 %s113_s27, 4  ;;  %s115_s30 = int_to_ptr.hbm [resolvable:$true] %s114_s30 }
  0x15   : > { %s116_s29 = sshll.u32 %s107_s28, 4  ;;  %s104_s2 = scalar_lea.sflag [#allocation3], %s103_s22  ;;  %s117_s29 = int_to_ptr.vmem [resolvable:$true] %s116_s29 }
  0x16   : > { %s474_s3 = smov 32   ;;  %s475_s4 = smov 2  }
  0x17   : > { %301 = dma.hbm_to_vmem [thread:$0]  (!%p299_p0), %s115_s30, 96, %s117_s29, %s104_s2, %s474_s3, %s474_s3, %s475_s4  }
  0x18   : > { %p124_p2 = scmp.lt.s32.totalorder %s472_s11, 3 }
  0x1a   : > { %p125_p3 = pnand %p280_p1, %p124_p2 }
  0x1b   : > { %s562_s5 = sand.u32 (!%p125_p3), 1, %s456_s7  }
  0x1c   : > { %128 = sbr.rel (%p125_p3) target bundleno = 52 (0x34), region = 24  ;;  %s131_s13 = scalar_lea.sflag (!%p125_p3), [#allocation3], %s562_s5 }
  0x1d   : > { %s292_s12 = smul.u32 (!%p125_p3), 6, %s562_s5 }
  0x1f   : > { %s134_s15 = scalar_lea.vmem (!%p125_p3), [#allocation2], %s292_s12 }
  0x21   : > { %443 = dma.done.wait (%p535_p8), %s131_s13, 96  }
  0x22   : > { %445 = vsyncadd (%p535_p8), %s131_s13, 4294967200  ;;  %s293_s16 = smul.u32 6, %s464_s9  ;;  %v157_v0 = vlaneseq  ;;  %s153_s17 = scalar_lea.vmem [#allocation5], %s292_s12  ;;  %v154_v1 = vld [vmem:[%s134_s15] sm:$0x3] }
  0x23   : > { %s188_s22 = sshll.u32 %s153_s17, 4  ;;  %v282_v2 = vld [vmem:[%s134_s15 + $0x2] sm:$0x3]  ;;  %v285_v3 = vld [vmem:[%s134_s15 + $0x4] sm:$0x3]  ;;  %s175_s9 = scalar_lea.sflag [#allocation4], %s562_s5  ;;  %s189_s22 = int_to_ptr.vmem [resolvable:$true] %s188_s22 }
  0x24   : > { %s187_s25 = scalar_lea.hbm %s609_s1, %s293_s16  ;;  %v281_v4 = vadd.f32 -0.485, %v154_v1  ;;  %v283_v5 = vadd.f32 -0.456, %v282_v2  ;;  %v286_v6 = vadd.f32 -0.406, %v285_v3 }
  0x25   : > { %vm159_vm0 = vcmp.lt.s32.totalorder %v157_v0, 256  ;;  %s190_s18 = sshll.u32 %s187_s25, 4  ;;  %s410_s30 = scalar_lea.hbm %s609_s1, 12  ;;  %s191_s18 = int_to_ptr.hbm [resolvable:$true] %s190_s18 }
  0x26   : > { %v156_v7 = vmul.f32 4.366812, %v281_v4  ;;  %v165_v8 = vmul.f32 4.464286, %v283_v5  ;;  %v171_v9 = vmul.f32 4.4444447, %v286_v6 }
  0x27   : > { %s404_s26 = sshra.s32 %s191_s18, 4  ;;  %s405_s26 = int_to_ptr.hbm [resolvable:$true] %s404_s26 }
  0x28   : > { %161 = vst.msk [vmem:[%s153_s17] sm:$0x3] %vm159_vm0, %v156_v7  ;;  %s406_s27 = scalar_lea.hbm %s405_s26, 6  ;;  %p411_p7 = scmp.lt.s32.totalorder %s405_s26, %s609_s1 }
  0x29   : > { %284 = vst.msk [vmem:[%s153_s17 + $0x2] sm:$0x3] %vm159_vm0, %v165_v8  ;;  %p407_p4 = scmp.ne.s32.totalorder %s405_s26, %s406_s27  ;;  %p412_p8 = scmp.lt.s32.totalorder %s410_s30, %s406_s27 }
  0x2a   : > { %287 = vst.msk [vmem:[%s153_s17 + $0x4] sm:$0x3] %vm159_vm0, %v171_v9 }
  0x2b   : > { %p408_p5 = pnand %p407_p4, %p539_p9  ;;  %p413_p10 = por %p412_p8, %p411_p7 }
  0x2d   : > { %p409_p6 = pneg %p408_p5 }
  0x2f   : > { %p414_p13 = pnand %p413_p10, %p409_p6 }
  0x31   : > { %417 = shalt.err (!%p414_p13)
}
  0x32   : > { %s476_s4 = smov 32   ;;  %s477_s5 = smov 2  }
  0x33   : > { %296 = dma.vmem_to_hbm [thread:$0]  (%p539_p9), %s189_s22, 96, %s191_s18, %s175_s9, %s476_s4, %s476_s4, %s477_s5  }
  0x34 PF: > { %s205_s12 = sand.u32 1, %s452_s6   ;;  %p303_p0 = pnand %p279_p12, %p546_p11 }
  0x35   : > { %s206_s13 = scalar_lea.sflag [#allocation4], %s205_s12 }
  0x36   : > { %p304_p1 = pneg %p303_p0 }
  0x38   : > { %447 = dma.done.wait (%p304_p1), %s206_s13, 96  }
  0x39   : > { %449 = vsyncadd (%p304_p1), %s206_s13, 4294967200  ;;  %s17_s11 = sadd.s32 1, %s472_s11   ;;  %s614_s6 = smov %s456_s7 }
  0x3a   : > { %p14_p2 = scmp.ge.s32.totalorder %s17_s11, 4   ;;  %s615_s7 = smov %s460_s8 }
  0x3b   : > { %s616_s8 = smov %s544_s20  ;;  %s617_s9 = smov %s468_s10 }
  0x3c   : > { %s618_s10 = smov %s620_s14  ;;  %16 = sbr.rel (!%p14_p2) target bundleno = 6 (0x6), region = 73 }
  0x41   :  { %212 = vsyncpa [#allocation3], 1 }
  0x42   :  { %214 = vsyncpa [#allocation3 + $0x1], 1 }
  0x43   :  { %215 = vsyncpa [#allocation4], 1 }
  0x44   :  { %217 = vsyncpa [#allocation4 + $0x1], 1 }

</bundles_post_ra>
